<compile_context>
chip_gen: v6e
topology: v6e:2x2x1
jax: 0.10.0
libtpu: 0.0.40
codegen_flags: <defaults>
</compile_context>

<pallas_src>
import functools

import jax
import jax.numpy as jnp
from jax.experimental import pallas as pl
from jax.experimental.pallas import tpu as pltpu


# ---------------------------------------------------------------------------
# Fused Block kernel (one grid step per image)
# ---------------------------------------------------------------------------
def _block_kernel(x_ref, sh_ref, c1_ref, b1_ref, c2_ref, b2_ref, sl_ref,
                  selm_ref, selw_ref, mskip_ref, bskip_ref, o_ref,
                  *, H, W, Cout):
    f32 = jnp.float32
    NEG = f32(-3.0e38)
    L2 = W * Cout
    Ho = H // 2

    xp = x_ref[0]            # (H, W*Cin)  lane-packed NHWC slab for this image
    shm = sh_ref[0]          # (H, H): (shm @ v)[i] = v[i-1], zero row at i=0
    shp = sh_ref[1]          # (H, H): (shp @ v)[i] = v[i+1], zero row at i=H-1

    def dot(a, b):
        return jnp.dot(a, b, preferred_element_type=f32)

    def sepconv_bn(r, c_ref, b_ref):
        # depthwise 3x3 (zero pad 1) + pointwise 1x1 + folded BN, as
        # sum_dy (row_shift_dy(r)) @ C_dy  + shift.
        up = dot(shm, r)                     # rows hold r[i-1] (zero padded)
        dn = dot(shp, r)                     # rows hold r[i+1] (zero padded)
        y = dot(up, c_ref[0]) + dot(r, c_ref[1]) + dot(dn, c_ref[2])
        return y + b_ref[...]

    # rep: ReLU -> SepConv(Cin->Cout)+BN -> ReLU -> SepConv(Cout->Cout)+BN
    r0 = jnp.maximum(xp, 0.0)
    y1 = sepconv_bn(r0, c1_ref, b1_ref)      # (H, W*Cout)
    r1 = jnp.maximum(y1, 0.0)
    y2 = sepconv_bn(r1, c2_ref, b2_ref)      # (H, W*Cout)

    # MaxPool2d(3, stride=2, padding=1) evaluated ONLY at the Ho output rows:
    # selm[k] gathers rows 2o-1 / 2o / 2o+1 (one-hot, zero row where padded),
    # then a 3-wide column max via lane-group shift matmuls + -BIG masks,
    # then stride-2 column selection via one one-hot matmul.
    ro = jax.lax.broadcasted_iota(jnp.int32, (Ho, L2), 0)
    li = jax.lax.broadcasted_iota(jnp.int32, (Ho, L2), 1)
    upg = jnp.where(ro >= 1, dot(selm_ref[0], y2), NEG)   # row 2o-1 (pad at o=0)
    ctr = dot(selm_ref[1], y2)                            # row 2o
    dng = dot(selm_ref[2], y2)                            # row 2o+1 (H even -> in range)
    m1 = jnp.maximum(jnp.maximum(upg, ctr), dng)          # (Ho, W*Cout)
    lft = jnp.where(li >= Cout, dot(m1, sl_ref[0]), NEG)             # w-1
    rgt = jnp.where(li < (W - 1) * Cout, dot(m1, sl_ref[1]), NEG)    # w+1
    m2 = jnp.maximum(jnp.maximum(lft, m1), rgt)
    pooled = dot(m2, selw_ref[...])                       # (Ho, Wo*Cout)

    # skip: Conv2d(Cin->Cout, 1, stride=2) + BN on the raw (non-ReLU'd) input.
    skip = dot(dot(selm_ref[1], xp), mskip_ref[...]) + bskip_ref[...]

    o_ref[0] = (pooled + skip).astype(o_ref.dtype)


# ---------------------------------------------------------------------------
# Parameter packing: fold BN scales into weights and build the constant
# shift / gather / sep-conv matrices used by the kernel.
# ---------------------------------------------------------------------------
def pack_block_params(p, H, W):
    Cin, Cout = p["pw1_w"].shape
    Ho, Wo = H // 2, W // 2
    f32 = jnp.float32

    pw1 = p["pw1_w"] * p["bn1_scale"][None, :]
    pw2 = p["pw2_w"] * p["bn2_scale"][None, :]
    wsk = p["skip_w"] * p["skipbn_scale"][None, :]

    def sep_mats(dw, pw, cin):
        # M_dy[(w+dx)*cin + c, w*Cout + o] = dw[dy+1, dx+1, c] * pw[c, o]
        mats = []
        for dy in (-1, 0, 1):
            m = jnp.zeros((W * cin, W * Cout), f32)
            for dx in (-1, 0, 1):
                kblk = dw[dy + 1, dx + 1, :, None] * pw      # (cin, Cout)
                m = m + jnp.kron(jnp.eye(W, k=-dx, dtype=f32), kblk)
            mats.append(m)
        return jnp.stack(mats)                               # (3, W*cin, W*Cout)

    eye = functools.partial(jnp.eye, dtype=f32)
    e2 = eye(W)[:, ::2]                                      # (W, Wo): w == 2*j
    shm = eye(H, k=-1)                                       # v[i-1], zero row 0
    shp = eye(H, k=1)                                        # v[i+1], zero row H-1
    selh = eye(H)[::2, :]                                    # (Ho, H) even rows

    return {
        "c1": sep_mats(p["dw1_w"], pw1, Cin),                # (3, W*Cin, W*Cout)
        "b1": jnp.tile(p["bn1_shift"], W)[None, :],          # (1, W*Cout)
        "c2": sep_mats(p["dw2_w"], pw2, Cout),               # (3, W*Cout, W*Cout)
        "b2": jnp.tile(p["bn2_shift"], W)[None, :],
        "sh": jnp.stack([shm, shp]),                         # row shift -1 / +1
        "sl": jnp.stack([eye(W * Cout, k=Cout),              # col group shift -1
                         eye(W * Cout, k=-Cout)]),           # col group shift +1
        # folded "gather stride-2 rows o -> source rows 2o-1 / 2o / 2o+1"
        "selm": jnp.stack([selh @ shm, selh, selh @ shp]),   # (3, Ho, H)
        "selw": jnp.kron(e2, eye(Cout)),                     # (W*Cout, Wo*Cout)
        "mskip": jnp.kron(e2, wsk),                          # strided 1x1 skip + BN scale
        "bskip": jnp.tile(p["skipbn_shift"], Wo)[None, :],   # (1, Wo*Cout)
    }


def block_forward(x_nchw, packed):
    N, Cin, H, W = x_nchw.shape
    Cout = packed["b1"].shape[1] // W
    Ho, Wo = H // 2, W // 2
    assert H % 2 == 0 and W % 2 == 0, "even spatial dims assumed"

    # NCHW -> NHWC -> lane-packed (N, H, W*Cin) slab (contiguous reshape).
    xp = jnp.transpose(x_nchw, (0, 2, 3, 1)).reshape(N, H, W * Cin)

    kern = functools.partial(_block_kernel, H=H, W=W, Cout=Cout)
    out_packed = pl.pallas_call(
        kern,
        out_shape=jax.ShapeDtypeStruct((N, Ho, Wo * Cout), x_nchw.dtype),
        grid=(N,),
        in_specs=[
            pl.BlockSpec((1, H, W * Cin), lambda n: (n, 0, 0)),
            pl.BlockSpec((2, H, H), lambda n: (0, 0, 0)),
            pl.BlockSpec((3, W * Cin, W * Cout), lambda n: (0, 0, 0)),
            pl.BlockSpec((1, W * Cout), lambda n: (0, 0)),
            pl.BlockSpec((3, W * Cout, W * Cout), lambda n: (0, 0, 0)),
            pl.BlockSpec((1, W * Cout), lambda n: (0, 0)),
            pl.BlockSpec((2, W * Cout, W * Cout), lambda n: (0, 0, 0)),
            pl.BlockSpec((3, Ho, H), lambda n: (0, 0, 0)),
            pl.BlockSpec((W * Cout, Wo * Cout), lambda n: (0, 0)),
            pl.BlockSpec((W * Cin, Wo * Cout), lambda n: (0, 0)),
            pl.BlockSpec((1, Wo * Cout), lambda n: (0, 0)),
        ],
        out_specs=pl.BlockSpec((1, Ho, Wo * Cout), lambda n: (n, 0, 0)),
        compiler_params=pltpu.CompilerParams(
            dimension_semantics=("parallel",)),   # v7x: batch across both TCs
    )(xp, packed["sh"], packed["c1"], packed["b1"], packed["c2"], packed["b2"],
      packed["sl"], packed["selm"], packed["selw"], packed["mskip"],
      packed["bskip"])

    # (N, Ho, Wo*Cout) is the contiguous NHWC flattening -> back to NCHW.
    return jnp.transpose(out_packed.reshape(N, Ho, Wo, Cout), (0, 3, 1, 2))


# ---------------------------------------------------------------------------
# Synthetic deterministic parameters (inference-mode BN folded to scale/shift)
# ---------------------------------------------------------------------------
def _bn_fold(key, c, eps=1e-5):
    k1, k2, k3, k4 = jax.random.split(key, 4)
    gamma = 1.0 + 0.1 * jax.random.normal(k1, (c,), jnp.float32)
    beta = 0.1 * jax.random.normal(k2, (c,), jnp.float32)
    mean = 0.1 * jax.random.normal(k3, (c,), jnp.float32)
    var = 0.5 + 0.2 * jnp.abs(jax.random.normal(k4, (c,), jnp.float32))
    scale = gamma / jnp.sqrt(var + eps)
    shift = beta - mean * scale
    return scale, shift


def init_block_params(key, cin, cout):
    ks = jax.random.split(key, 8)
    p = {}
    p["dw1_w"] = 0.1 * jax.random.normal(ks[0], (3, 3, cin), jnp.float32)
    p["pw1_w"] = 0.1 * jax.random.normal(ks[1], (cin, cout), jnp.float32)
    p["bn1_scale"], p["bn1_shift"] = _bn_fold(ks[2], cout)
    p["dw2_w"] = 0.1 * jax.random.normal(ks[3], (3, 3, cout), jnp.float32)
    p["pw2_w"] = 0.1 * jax.random.normal(ks[4], (cout, cout), jnp.float32)
    p["bn2_scale"], p["bn2_shift"] = _bn_fold(ks[5], cout)
    p["skip_w"] = 0.1 * jax.random.normal(ks[6], (cin, cout), jnp.float32)
    p["skipbn_scale"], p["skipbn_shift"] = _bn_fold(ks[7], cout)
    return p


# ---------------------------------------------------------------------------
# Pure-JAX (XLA) reference for correctness checking
# ---------------------------------------------------------------------------
def _reference_forward(x_nchw, p):
    prec = jax.lax.Precision.HIGHEST

    def dwconv(x, w33c):
        C = x.shape[1]
        w = jnp.transpose(w33c, (2, 0, 1))[:, None, :, :]        # (C,1,3,3)
        return jax.lax.conv_general_dilated(
            x, w, (1, 1), ((1, 1), (1, 1)),
            dimension_numbers=("NCHW", "OIHW", "NCHW"),
            feature_group_count=C, precision=prec)

    def pwconv(x, wco, stride=1):
        w = jnp.transpose(wco, (1, 0))[:, :, None, None]         # (Cout,Cin,1,1)
        return jax.lax.conv_general_dilated(
            x, w, (stride, stride), ((0, 0), (0, 0)),
            dimension_numbers=("NCHW", "OIHW", "NCHW"), precision=prec)

    def bn(x, scale, shift):
        return x * scale[None, :, None, None] + shift[None, :, None, None]

    y = jax.nn.relu(x_nchw)
    y = bn(pwconv(dwconv(y, p["dw1_w"]), p["pw1_w"]), p["bn1_scale"], p["bn1_shift"])
    y = jax.nn.relu(y)
    y = bn(pwconv(dwconv(y, p["dw2_w"]), p["pw2_w"]), p["bn2_scale"], p["bn2_shift"])
    y = jax.lax.reduce_window(y, -jnp.inf, jax.lax.max,
                              (1, 1, 3, 3), (1, 1, 2, 2),
                              ((0, 0), (0, 0), (1, 1), (1, 1)))
    s = bn(pwconv(x_nchw, p["skip_w"], stride=2), p["skipbn_scale"], p["skipbn_shift"])
    return y + s


if __name__ == "__main__":
    key = jax.random.PRNGKey(0)
    kx, kp = jax.random.split(key)
    N, Cin, H, W = 2, 4, 16, 16
    Cout = 8

    x = jax.random.normal(kx, (N, Cin, H, W), jnp.float32)
    params = init_block_params(kp, Cin, Cout)
    packed = pack_block_params(params, H, W)

    out = jax.block_until_ready(jax.jit(block_forward)(x, packed))
    assert out.shape == (N, Cout, H // 2, W // 2), out.shape
    assert out.dtype == jnp.float32

    ref = _reference_forward(x, params)
    err = float(jnp.max(jnp.abs(out - ref)))
    assert err < 3e-2, f"max abs error vs reference: {err}"
    print("KERNEL_OK")
</pallas_src>

<mosaic_0001>
module attributes {stable_mosaic.version = 11 : i64} {
  func.func @_block_kernel(%arg0: i32, %arg1: memref<1x16x64xf32, #tpu.memory_space<vmem>>, %arg2: memref<2x16x16xf32, #tpu.memory_space<vmem>>, %arg3: memref<3x64x128xf32, #tpu.memory_space<vmem>>, %arg4: memref<1x128xf32, #tpu.memory_space<vmem>>, %arg5: memref<3x128x128xf32, #tpu.memory_space<vmem>>, %arg6: memref<1x128xf32, #tpu.memory_space<vmem>>, %arg7: memref<2x128x128xf32, #tpu.memory_space<vmem>>, %arg8: memref<3x8x16xf32, #tpu.memory_space<vmem>>, %arg9: memref<128x64xf32, #tpu.memory_space<vmem>>, %arg10: memref<64x64xf32, #tpu.memory_space<vmem>>, %arg11: memref<1x64xf32, #tpu.memory_space<vmem>>, %arg12: memref<1x8x64xf32, #tpu.memory_space<vmem>>) attributes {dimension_semantics = [#tpu.dimension_semantics<parallel>], iteration_bounds = array<i64: 2>, scalar_prefetch = 0 : i64, scratch_operands = 0 : i64, tpu.core_type = #tpu.core_type<tc>, window_params = [{transform_indices = @transform_0, window_bounds = array<i64: 1, 16, 64>}, {pipeline_mode = #tpu.pipeline_mode<synchronous>, transform_indices = @transform_1, window_bounds = array<i64: 2, 16, 16>}, {pipeline_mode = #tpu.pipeline_mode<synchronous>, transform_indices = @transform_2, window_bounds = array<i64: 3, 64, 128>}, {pipeline_mode = #tpu.pipeline_mode<synchronous>, transform_indices = @transform_3, window_bounds = array<i64: 1, 128>}, {pipeline_mode = #tpu.pipeline_mode<synchronous>, transform_indices = @transform_4, window_bounds = array<i64: 3, 128, 128>}, {pipeline_mode = #tpu.pipeline_mode<synchronous>, transform_indices = @transform_5, window_bounds = array<i64: 1, 128>}, {pipeline_mode = #tpu.pipeline_mode<synchronous>, transform_indices = @transform_6, window_bounds = array<i64: 2, 128, 128>}, {pipeline_mode = #tpu.pipeline_mode<synchronous>, transform_indices = @transform_7, window_bounds = array<i64: 3, 8, 16>}, {pipeline_mode = #tpu.pipeline_mode<synchronous>, transform_indices = @transform_8, window_bounds = array<i64: 128, 64>}, {pipeline_mode = #tpu.pipeline_mode<synchronous>, transform_indices = @transform_9, window_bounds = array<i64: 64, 64>}, {pipeline_mode = #tpu.pipeline_mode<synchronous>, transform_indices = @transform_10, window_bounds = array<i64: 1, 64>}, {transform_indices = @transform_11, window_bounds = array<i64: 1, 8, 64>}]} {
    %c0 = arith.constant 0 : index
    %c0_0 = arith.constant 0 : index
    %c0_1 = arith.constant 0 : index
    %0 = vector.load %arg1[%c0, %c0_0, %c0_1] : memref<1x16x64xf32, #tpu.memory_space<vmem>>, vector<1x16x64xf32>
    %1 = vector.shape_cast %0 : vector<1x16x64xf32> to vector<16x64xf32>
    %c0_2 = arith.constant 0 : index
    %c0_3 = arith.constant 0 : index
    %c0_4 = arith.constant 0 : index
    %2 = vector.load %arg2[%c0_2, %c0_3, %c0_4] : memref<2x16x16xf32, #tpu.memory_space<vmem>>, vector<1x16x16xf32>
    %3 = vector.shape_cast %2 : vector<1x16x16xf32> to vector<16x16xf32>
    %c1 = arith.constant 1 : index
    %c0_5 = arith.constant 0 : index
    %c0_6 = arith.constant 0 : index
    %4 = vector.load %arg2[%c1, %c0_5, %c0_6] : memref<2x16x16xf32, #tpu.memory_space<vmem>>, vector<1x16x16xf32>
    %5 = vector.shape_cast %4 : vector<1x16x16xf32> to vector<16x16xf32>
    %cst = arith.constant 0.000000e+00 : f32
    %6 = vector.broadcast %cst : f32 to vector<16x64xf32>
    %7 = arith.maximumf %1, %6 : vector<16x64xf32>
    %cst_7 = arith.constant dense<0.000000e+00> : vector<16x64xf32>
    %8 = tpu.matmul %3, %7, %cst_7 {dimension_numbers = #tpu.dot_dimension_numbers<[1], [0], [0], [1], [0, 0, 1, 1], [], []>} : vector<16x16xf32>, vector<16x64xf32>, vector<16x64xf32> -> vector<16x64xf32>
    %cst_8 = arith.constant dense<0.000000e+00> : vector<16x64xf32>
    %9 = tpu.matmul %5, %7, %cst_8 {dimension_numbers = #tpu.dot_dimension_numbers<[1], [0], [0], [1], [0, 0, 1, 1], [], []>} : vector<16x16xf32>, vector<16x64xf32>, vector<16x64xf32> -> vector<16x64xf32>
    %c0_9 = arith.constant 0 : index
    %c0_10 = arith.constant 0 : index
    %c0_11 = arith.constant 0 : index
    %10 = vector.load %arg3[%c0_9, %c0_10, %c0_11] : memref<3x64x128xf32, #tpu.memory_space<vmem>>, vector<1x64x128xf32>
    %11 = vector.shape_cast %10 : vector<1x64x128xf32> to vector<64x128xf32>
    %cst_12 = arith.constant dense<0.000000e+00> : vector<16x128xf32>
    %12 = tpu.matmul %8, %11, %cst_12 {dimension_numbers = #tpu.dot_dimension_numbers<[1], [0], [0], [1], [0, 0, 1, 1], [], []>} : vector<16x64xf32>, vector<64x128xf32>, vector<16x128xf32> -> vector<16x128xf32>
    %c1_13 = arith.constant 1 : index
    %c0_14 = arith.constant 0 : index
    %c0_15 = arith.constant 0 : index
    %13 = vector.load %arg3[%c1_13, %c0_14, %c0_15] : memref<3x64x128xf32, #tpu.memory_space<vmem>>, vector<1x64x128xf32>
    %14 = vector.shape_cast %13 : vector<1x64x128xf32> to vector<64x128xf32>
    %cst_16 = arith.constant dense<0.000000e+00> : vector<16x128xf32>
    %15 = tpu.matmul %7, %14, %cst_16 {dimension_numbers = #tpu.dot_dimension_numbers<[1], [0], [0], [1], [0, 0, 1, 1], [], []>} : vector<16x64xf32>, vector<64x128xf32>, vector<16x128xf32> -> vector<16x128xf32>
    %16 = arith.addf %12, %15 : vector<16x128xf32>
    %c2 = arith.constant 2 : index
    %c0_17 = arith.constant 0 : index
    %c0_18 = arith.constant 0 : index
    %17 = vector.load %arg3[%c2, %c0_17, %c0_18] : memref<3x64x128xf32, #tpu.memory_space<vmem>>, vector<1x64x128xf32>
    %18 = vector.shape_cast %17 : vector<1x64x128xf32> to vector<64x128xf32>
    %cst_19 = arith.constant dense<0.000000e+00> : vector<16x128xf32>
    %19 = tpu.matmul %9, %18, %cst_19 {dimension_numbers = #tpu.dot_dimension_numbers<[1], [0], [0], [1], [0, 0, 1, 1], [], []>} : vector<16x64xf32>, vector<64x128xf32>, vector<16x128xf32> -> vector<16x128xf32>
    %20 = arith.addf %16, %19 : vector<16x128xf32>
    %c0_20 = arith.constant 0 : index
    %c0_21 = arith.constant 0 : index
    %21 = vector.load %arg4[%c0_20, %c0_21] : memref<1x128xf32, #tpu.memory_space<vmem>>, vector<1x128xf32>
    %22 = vector.broadcast %21 : vector<1x128xf32> to vector<16x128xf32>
    %23 = arith.addf %20, %22 : vector<16x128xf32>
    %cst_22 = arith.constant 0.000000e+00 : f32
    %24 = vector.broadcast %cst_22 : f32 to vector<16x128xf32>
    %25 = arith.maximumf %23, %24 : vector<16x128xf32>
    %cst_23 = arith.constant dense<0.000000e+00> : vector<16x128xf32>
    %26 = tpu.matmul %3, %25, %cst_23 {dimension_numbers = #tpu.dot_dimension_numbers<[1], [0], [0], [1], [0, 0, 1, 1], [], []>} : vector<16x16xf32>, vector<16x128xf32>, vector<16x128xf32> -> vector<16x128xf32>
    %cst_24 = arith.constant dense<0.000000e+00> : vector<16x128xf32>
    %27 = tpu.matmul %5, %25, %cst_24 {dimension_numbers = #tpu.dot_dimension_numbers<[1], [0], [0], [1], [0, 0, 1, 1], [], []>} : vector<16x16xf32>, vector<16x128xf32>, vector<16x128xf32> -> vector<16x128xf32>
    %c0_25 = arith.constant 0 : index
    %c0_26 = arith.constant 0 : index
    %c0_27 = arith.constant 0 : index
    %28 = vector.load %arg5[%c0_25, %c0_26, %c0_27] : memref<3x128x128xf32, #tpu.memory_space<vmem>>, vector<1x128x128xf32>
    %29 = vector.shape_cast %28 : vector<1x128x128xf32> to vector<128x128xf32>
    %cst_28 = arith.constant dense<0.000000e+00> : vector<16x128xf32>
    %30 = tpu.matmul %26, %29, %cst_28 {dimension_numbers = #tpu.dot_dimension_numbers<[1], [0], [0], [1], [0, 0, 1, 1], [], []>} : vector<16x128xf32>, vector<128x128xf32>, vector<16x128xf32> -> vector<16x128xf32>
    %c1_29 = arith.constant 1 : index
    %c0_30 = arith.constant 0 : index
    %c0_31 = arith.constant 0 : index
    %31 = vector.load %arg5[%c1_29, %c0_30, %c0_31] : memref<3x128x128xf32, #tpu.memory_space<vmem>>, vector<1x128x128xf32>
    %32 = vector.shape_cast %31 : vector<1x128x128xf32> to vector<128x128xf32>
    %cst_32 = arith.constant dense<0.000000e+00> : vector<16x128xf32>
    %33 = tpu.matmul %25, %32, %cst_32 {dimension_numbers = #tpu.dot_dimension_numbers<[1], [0], [0], [1], [0, 0, 1, 1], [], []>} : vector<16x128xf32>, vector<128x128xf32>, vector<16x128xf32> -> vector<16x128xf32>
    %34 = arith.addf %30, %33 : vector<16x128xf32>
    %c2_33 = arith.constant 2 : index
    %c0_34 = arith.constant 0 : index
    %c0_35 = arith.constant 0 : index
    %35 = vector.load %arg5[%c2_33, %c0_34, %c0_35] : memref<3x128x128xf32, #tpu.memory_space<vmem>>, vector<1x128x128xf32>
    %36 = vector.shape_cast %35 : vector<1x128x128xf32> to vector<128x128xf32>
    %cst_36 = arith.constant dense<0.000000e+00> : vector<16x128xf32>
    %37 = tpu.matmul %27, %36, %cst_36 {dimension_numbers = #tpu.dot_dimension_numbers<[1], [0], [0], [1], [0, 0, 1, 1], [], []>} : vector<16x128xf32>, vector<128x128xf32>, vector<16x128xf32> -> vector<16x128xf32>
    %38 = arith.addf %34, %37 : vector<16x128xf32>
    %c0_37 = arith.constant 0 : index
    %c0_38 = arith.constant 0 : index
    %39 = vector.load %arg6[%c0_37, %c0_38] : memref<1x128xf32, #tpu.memory_space<vmem>>, vector<1x128xf32>
    %40 = vector.broadcast %39 : vector<1x128xf32> to vector<16x128xf32>
    %41 = arith.addf %38, %40 : vector<16x128xf32>
    %42 = tpu.iota {dimensions = array<i32: 0>} : vector<8x128xi32>
    %43 = tpu.iota {dimensions = array<i32: 1>} : vector<8x128xi32>
    %c1_i32 = arith.constant 1 : i32
    %44 = vector.broadcast %c1_i32 : i32 to vector<8x128xi32>
    %45 = arith.cmpi sge, %42, %44 : vector<8x128xi32>
    %c0_39 = arith.constant 0 : index
    %c0_40 = arith.constant 0 : index
    %c0_41 = arith.constant 0 : index
    %46 = vector.load %arg8[%c0_39, %c0_40, %c0_41] : memref<3x8x16xf32, #tpu.memory_space<vmem>>, vector<1x8x16xf32>
    %47 = vector.shape_cast %46 : vector<1x8x16xf32> to vector<8x16xf32>
    %cst_42 = arith.constant dense<0.000000e+00> : vector<8x128xf32>
    %48 = tpu.matmul %47, %41, %cst_42 {dimension_numbers = #tpu.dot_dimension_numbers<[1], [0], [0], [1], [0, 0, 1, 1], [], []>} : vector<8x16xf32>, vector<16x128xf32>, vector<8x128xf32> -> vector<8x128xf32>
    %cst_43 = arith.constant -3.000000e+38 : f32
    %49 = vector.broadcast %cst_43 : f32 to vector<8x128xf32>
    %50 = arith.select %45, %48, %49 : vector<8x128xi1>, vector<8x128xf32>
    %c1_44 = arith.constant 1 : index
    %c0_45 = arith.constant 0 : index
    %c0_46 = arith.constant 0 : index
    %51 = vector.load %arg8[%c1_44, %c0_45, %c0_46] : memref<3x8x16xf32, #tpu.memory_space<vmem>>, vector<1x8x16xf32>
    %52 = vector.shape_cast %51 : vector<1x8x16xf32> to vector<8x16xf32>
    %cst_47 = arith.constant dense<0.000000e+00> : vector<8x128xf32>
    %53 = tpu.matmul %52, %41, %cst_47 {dimension_numbers = #tpu.dot_dimension_numbers<[1], [0], [0], [1], [0, 0, 1, 1], [], []>} : vector<8x16xf32>, vector<16x128xf32>, vector<8x128xf32> -> vector<8x128xf32>
    %c2_48 = arith.constant 2 : index
    %c0_49 = arith.constant 0 : index
    %c0_50 = arith.constant 0 : index
    %54 = vector.load %arg8[%c2_48, %c0_49, %c0_50] : memref<3x8x16xf32, #tpu.memory_space<vmem>>, vector<1x8x16xf32>
    %55 = vector.shape_cast %54 : vector<1x8x16xf32> to vector<8x16xf32>
    %cst_51 = arith.constant dense<0.000000e+00> : vector<8x128xf32>
    %56 = tpu.matmul %55, %41, %cst_51 {dimension_numbers = #tpu.dot_dimension_numbers<[1], [0], [0], [1], [0, 0, 1, 1], [], []>} : vector<8x16xf32>, vector<16x128xf32>, vector<8x128xf32> -> vector<8x128xf32>
    %57 = arith.maximumf %50, %53 : vector<8x128xf32>
    %58 = arith.maximumf %57, %56 : vector<8x128xf32>
    %c8_i32 = arith.constant 8 : i32
    %59 = vector.broadcast %c8_i32 : i32 to vector<8x128xi32>
    %60 = arith.cmpi sge, %43, %59 : vector<8x128xi32>
    %c0_52 = arith.constant 0 : index
    %c0_53 = arith.constant 0 : index
    %c0_54 = arith.constant 0 : index
    %61 = vector.load %arg7[%c0_52, %c0_53, %c0_54] : memref<2x128x128xf32, #tpu.memory_space<vmem>>, vector<1x128x128xf32>
    %62 = vector.shape_cast %61 : vector<1x128x128xf32> to vector<128x128xf32>
    %cst_55 = arith.constant dense<0.000000e+00> : vector<8x128xf32>
    %63 = tpu.matmul %58, %62, %cst_55 {dimension_numbers = #tpu.dot_dimension_numbers<[1], [0], [0], [1], [0, 0, 1, 1], [], []>} : vector<8x128xf32>, vector<128x128xf32>, vector<8x128xf32> -> vector<8x128xf32>
    %cst_56 = arith.constant -3.000000e+38 : f32
    %64 = vector.broadcast %cst_56 : f32 to vector<8x128xf32>
    %65 = arith.select %60, %63, %64 : vector<8x128xi1>, vector<8x128xf32>
    %c120_i32 = arith.constant 120 : i32
    %66 = vector.broadcast %c120_i32 : i32 to vector<8x128xi32>
    %67 = arith.cmpi slt, %43, %66 : vector<8x128xi32>
    %c1_57 = arith.constant 1 : index
    %c0_58 = arith.constant 0 : index
    %c0_59 = arith.constant 0 : index
    %68 = vector.load %arg7[%c1_57, %c0_58, %c0_59] : memref<2x128x128xf32, #tpu.memory_space<vmem>>, vector<1x128x128xf32>
    %69 = vector.shape_cast %68 : vector<1x128x128xf32> to vector<128x128xf32>
    %cst_60 = arith.constant dense<0.000000e+00> : vector<8x128xf32>
    %70 = tpu.matmul %58, %69, %cst_60 {dimension_numbers = #tpu.dot_dimension_numbers<[1], [0], [0], [1], [0, 0, 1, 1], [], []>} : vector<8x128xf32>, vector<128x128xf32>, vector<8x128xf32> -> vector<8x128xf32>
    %cst_61 = arith.constant -3.000000e+38 : f32
    %71 = vector.broadcast %cst_61 : f32 to vector<8x128xf32>
    %72 = arith.select %67, %70, %71 : vector<8x128xi1>, vector<8x128xf32>
    %73 = arith.maximumf %65, %58 : vector<8x128xf32>
    %74 = arith.maximumf %73, %72 : vector<8x128xf32>
    %c0_62 = arith.constant 0 : index
    %c0_63 = arith.constant 0 : index
    %75 = vector.load %arg9[%c0_62, %c0_63] : memref<128x64xf32, #tpu.memory_space<vmem>>, vector<128x64xf32>
    %cst_64 = arith.constant dense<0.000000e+00> : vector<8x64xf32>
    %76 = tpu.matmul %74, %75, %cst_64 {dimension_numbers = #tpu.dot_dimension_numbers<[1], [0], [0], [1], [0, 0, 1, 1], [], []>} : vector<8x128xf32>, vector<128x64xf32>, vector<8x64xf32> -> vector<8x64xf32>
    %c1_65 = arith.constant 1 : index
    %c0_66 = arith.constant 0 : index
    %c0_67 = arith.constant 0 : index
    %77 = vector.load %arg8[%c1_65, %c0_66, %c0_67] : memref<3x8x16xf32, #tpu.memory_space<vmem>>, vector<1x8x16xf32>
    %78 = vector.shape_cast %77 : vector<1x8x16xf32> to vector<8x16xf32>
    %cst_68 = arith.constant dense<0.000000e+00> : vector<8x64xf32>
    %79 = tpu.matmul %78, %1, %cst_68 {dimension_numbers = #tpu.dot_dimension_numbers<[1], [0], [0], [1], [0, 0, 1, 1], [], []>} : vector<8x16xf32>, vector<16x64xf32>, vector<8x64xf32> -> vector<8x64xf32>
    %c0_69 = arith.constant 0 : index
    %c0_70 = arith.constant 0 : index
    %80 = vector.load %arg10[%c0_69, %c0_70] : memref<64x64xf32, #tpu.memory_space<vmem>>, vector<64x64xf32>
    %cst_71 = arith.constant dense<0.000000e+00> : vector<8x64xf32>
    %81 = tpu.matmul %79, %80, %cst_71 {dimension_numbers = #tpu.dot_dimension_numbers<[1], [0], [0], [1], [0, 0, 1, 1], [], []>} : vector<8x64xf32>, vector<64x64xf32>, vector<8x64xf32> -> vector<8x64xf32>
    %c0_72 = arith.constant 0 : index
    %c0_73 = arith.constant 0 : index
    %82 = vector.load %arg11[%c0_72, %c0_73] : memref<1x64xf32, #tpu.memory_space<vmem>>, vector<1x64xf32>
    %83 = vector.broadcast %82 : vector<1x64xf32> to vector<8x64xf32>
    %84 = arith.addf %81, %83 : vector<8x64xf32>
    %85 = arith.addf %76, %84 : vector<8x64xf32>
    %c0_74 = arith.constant 0 : index
    %c0_75 = arith.constant 0 : index
    %c0_76 = arith.constant 0 : index
    %86 = vector.load %arg12[%c0_74, %c0_75, %c0_76] : memref<1x8x64xf32, #tpu.memory_space<vmem>>, vector<1x8x64xf32>
    %87 = vector.shape_cast %86 : vector<1x8x64xf32> to vector<8x64xf32>
    %88 = vector.shape_cast %85 : vector<8x64xf32> to vector<1x8x64xf32>
    tpu.vector_store %arg12[%c0_74, %c0_75, %c0_76], %88 {strides = array<i32>} : memref<1x8x64xf32, #tpu.memory_space<vmem>>, vector<1x8x64xf32>,
    return
  }
  func.func @transform_0(%arg0: i32) -> (i32, i32, i32) {
    %c0_i32 = arith.constant 0 : i32
    %c0_i32_0 = arith.constant 0 : i32
    %c0_i32_1 = arith.constant 0 : i32
    return %arg0, %c0_i32, %c0_i32_0 : i32, i32, i32
  }
  func.func @transform_1(%arg0: i32) -> (i32, i32, i32) {
    %c0_i32 = arith.constant 0 : i32
    %c0_i32_0 = arith.constant 0 : i32
    %c0_i32_1 = arith.constant 0 : i32
    %c0_i32_2 = arith.constant 0 : i32
    return %c0_i32, %c0_i32_0, %c0_i32_1 : i32, i32, i32
  }
  func.func @transform_2(%arg0: i32) -> (i32, i32, i32) {
    %c0_i32 = arith.constant 0 : i32
    %c0_i32_0 = arith.constant 0 : i32
    %c0_i32_1 = arith.constant 0 : i32
    %c0_i32_2 = arith.constant 0 : i32
    return %c0_i32, %c0_i32_0, %c0_i32_1 : i32, i32, i32
  }
  func.func @transform_3(%arg0: i32) -> (i32, i32) {
    %c0_i32 = arith.constant 0 : i32
    %c0_i32_0 = arith.constant 0 : i32
    %c0_i32_1 = arith.constant 0 : i32
    return %c0_i32, %c0_i32_0 : i32, i32
  }
  func.func @transform_4(%arg0: i32) -> (i32, i32, i32) {
    %c0_i32 = arith.constant 0 : i32
    %c0_i32_0 = arith.constant 0 : i32
    %c0_i32_1 = arith.constant 0 : i32
    %c0_i32_2 = arith.constant 0 : i32
    return %c0_i32, %c0_i32_0, %c0_i32_1 : i32, i32, i32
  }
  func.func @transform_5(%arg0: i32) -> (i32, i32) {
    %c0_i32 = arith.constant 0 : i32
    %c0_i32_0 = arith.constant 0 : i32
    %c0_i32_1 = arith.constant 0 : i32
    return %c0_i32, %c0_i32_0 : i32, i32
  }
  func.func @transform_6(%arg0: i32) -> (i32, i32, i32) {
    %c0_i32 = arith.constant 0 : i32
    %c0_i32_0 = arith.constant 0 : i32
    %c0_i32_1 = arith.constant 0 : i32
    %c0_i32_2 = arith.constant 0 : i32
    return %c0_i32, %c0_i32_0, %c0_i32_1 : i32, i32, i32
  }
  func.func @transform_7(%arg0: i32) -> (i32, i32, i32) {
    %c0_i32 = arith.constant 0 : i32
    %c0_i32_0 = arith.constant 0 : i32
    %c0_i32_1 = arith.constant 0 : i32
    %c0_i32_2 = arith.constant 0 : i32
    return %c0_i32, %c0_i32_0, %c0_i32_1 : i32, i32, i32
  }
  func.func @transform_8(%arg0: i32) -> (i32, i32) {
    %c0_i32 = arith.constant 0 : i32
    %c0_i32_0 = arith.constant 0 : i32
    %c0_i32_1 = arith.constant 0 : i32
    return %c0_i32, %c0_i32_0 : i32, i32
  }
  func.func @transform_9(%arg0: i32) -> (i32, i32) {
    %c0_i32 = arith.constant 0 : i32
    %c0_i32_0 = arith.constant 0 : i32
    %c0_i32_1 = arith.constant 0 : i32
    return %c0_i32, %c0_i32_0 : i32, i32
  }
  func.func @transform_10(%arg0: i32) -> (i32, i32) {
    %c0_i32 = arith.constant 0 : i32
    %c0_i32_0 = arith.constant 0 : i32
    %c0_i32_1 = arith.constant 0 : i32
    return %c0_i32, %c0_i32_0 : i32, i32
  }
  func.func @transform_11(%arg0: i32) -> (i32, i32, i32) {
    %c0_i32 = arith.constant 0 : i32
    %c0_i32_0 = arith.constant 0 : i32
    %c0_i32_1 = arith.constant 0 : i32
    return %arg0, %c0_i32, %c0_i32_0 : i32, i32, i32
  }
}

</mosaic_0001>

<bundles_post_ra>
// kernel: block_forward.1
= control target key start
LH: loop header
LB: loop body
LE: loop exit
PB: predicated region body
PF: predicated region fallthrough
CT: control target
= control target key end

     0   :  { %16 = vsyncpa [#allocation3], 0  ;;  %s3371_s0 = inlined_call_operand.vmem [shape: f32[2,16,64], index: 0, kind: input, shape index: {}]   ;;  %s3372_s1 = inlined_call_operand.vmem [shape: f32[2,16,16], index: 1, kind: input, shape index: {}]   ;;  %s3373_s2 = inlined_call_operand.vmem [shape: f32[3,64,128], index: 2, kind: input, shape index: {}]   ;;  %s3374_s3 = inlined_call_operand.vmem [shape: f32[1,128], index: 3, kind: input, shape index: {}]   ;;  %s3375_s4 = inlined_call_operand.vmem [shape: f32[3,128,128], index: 4, kind: input, shape index: {}]   ;;  %s3376_s5 = inlined_call_operand.vmem [shape: f32[1,128], index: 5, kind: input, shape index: {}]   ;;  %s3377_s6 = inlined_call_operand.hbm [shape: f32[2,128,128], index: 6, kind: input, shape index: {}]   ;;  %s3378_s7 = inlined_call_operand.hbm [shape: f32[3,8,16], index: 7, kind: input, shape index: {}]   ;;  %s3379_s8 = inlined_call_operand.vmem [shape: f32[128,64], index: 8, kind: input, shape index: {}]   ;;  %s3380_s9 = inlined_call_operand.hbm [shape: f32[64,64], index: 9, kind: input, shape index: {}]   ;;  %s3381_s10 = inlined_call_operand.vmem [shape: f32[1,64], index: 10, kind: input, shape index: {}]   ;;  %s3382_s11 = inlined_call_operand.vmem [shape: f32[2,8,64], index: 11, kind: output, shape index: {}]  }
   0x1   :  { %17 = vsyncpa [#allocation5], 0  ;;  %s2867_s17 = smov 0  }
   0x2 LB: > { %s2873_s18 = sadd.s32 4294967295, %s2798_s17   ;;  %p2062_p0 = scmp.ge.s32.totalorder %s2798_s17, 1  ;;  %s2798_s17 = sphi %s2867_s17, %s23_s17  }
   0x3   : > { %p290_p1 = scmp.lt.s32.totalorder %s2798_s17, 3  ;;  %p2685_p2 = scmp.eq.s32.totalorder %s2873_s18, 0 }
   0x4   : > { %s2800_s20 = smov [#allocation4]   ;;  %s2801_s22 = smov [#allocation2]  }
   0x5   : > { %p2878_p3 = pnand %p2062_p0, %p290_p1  ;;  %s330_s21 = sshll.u32 %s2800_s20, 4  ;;  %s331_s21 = int_to_ptr.vmem [resolvable:$true] %s330_s21 }
   0x6   : > { %s317_s23 = sshll.u32 %s2801_s22, 4  ;;  %s2802_s25 = smov [#allocation6]   ;;  %s318_s23 = int_to_ptr.vmem [resolvable:$true] %s317_s23 }
   0x7   : > { %p2675_p4 = pneg %p2878_p3  ;;  %s346_s26 = sshll.u32 %s2802_s25, 4  ;;  %s2890_s26 = int_to_ptr.vmem [resolvable:$true] %s346_s26 }
   0x8   : > { %s2717_s27 = scalar_lea.vmem %s331_s21, 384  ;;  %p2725_p10 = scmp.lt.s32.totalorder %s331_s21, %s331_s21 }
   0x9   : > { %p2886_p5 = pnand %p2685_p2, %p2675_p4  ;;  %p2718_p7 = scmp.ne.s32.totalorder %s331_s21, %s2717_s27 }
   0xa   : > { %p2726_p11 = scmp.lt.s32.totalorder %s2717_s27, %s2717_s27 }
   0xb   : > { %p2708_p6 = pneg %p2886_p5 }
   0xc   : > { %p2727_p12 = por %p2726_p11, %p2725_p10 }
   0xd   : > { %p2720_p8 = pnand %p2718_p7, %p2708_p6 }
   0xf   : > { %p2721_p9 = pneg %p2720_p8 }
  0x11   : > { %p2728_p13 = pnand %p2727_p12, %p2721_p9 }
  0x13   : > { %2731 = shalt.err (!%p2728_p13)
}
  0x14   : > { %s2803_s28 = smov 128   ;;  %s2804_s29 = smov 8  }
  0x15   : > { %2681 = dma.hbm_to_vmem [thread:$0]  (!%p2886_p5), %s3378_s7, 384, %s331_s21, [#allocation5], %s2803_s28, %s2803_s28, %s2804_s29  }
  0x16   : > { %s2743_s13 = scalar_lea.vmem %s318_s23, 4096  ;;  %p2751_p7 = scmp.lt.s32.totalorder %s318_s23, %s318_s23 }
  0x17   : > { %p2744_p0 = scmp.ne.s32.totalorder %s318_s23, %s2743_s13  ;;  %p2752_p8 = scmp.lt.s32.totalorder %s2743_s13, %s2743_s13 }
  0x19   : > { %p2746_p1 = pnand %p2744_p0, %p2708_p6  ;;  %p2753_p10 = por %p2752_p8, %p2751_p7 }
  0x1b   : > { %p2747_p4 = pneg %p2746_p1 }
  0x1d   : > { %p2754_p9 = pnand %p2753_p10, %p2747_p4 }
  0x1f   : > { %2757 = shalt.err (!%p2754_p9)
}
  0x20   : > { %2678 = dma.hbm_to_vmem [thread:$0]  (!%p2886_p5), %s3377_s6, 4096, %s318_s23, [#allocation3], %s2803_s28, %s2803_s28, %s2804_s29  }
  0x21   : > { %s2769_s16 = scalar_lea.vmem %s2890_s26, 1024  ;;  %p2777_p0 = scmp.lt.s32.totalorder %s2890_s26, %s2890_s26 }
  0x22   : > { %p2770_p11 = scmp.ne.s32.totalorder %s2890_s26, %s2769_s16  ;;  %p2778_p1 = scmp.lt.s32.totalorder %s2769_s16, %s2769_s16 }
  0x24   : > { %p2772_p12 = pnand %p2770_p11, %p2708_p6  ;;  %p2779_p4 = por %p2778_p1, %p2777_p0 }
  0x26   : > { %p2773_p13 = pneg %p2772_p12 }
  0x28   : > { %p2780_p7 = pnand %p2779_p4, %p2773_p13 }
  0x2a   : > { %2783 = shalt.err (!%p2780_p7)
}
  0x2b   : > { %2684 = dma.hbm_to_vmem [thread:$0]  (!%p2886_p5), %s3380_s9, 1024, %s2890_s26, [#allocation5], %s2803_s28, %s2803_s28, %s2804_s29  }
  0x2c   : > { %373 = sbr.rel (%p2878_p3) target bundleno = 1477 (0x5c5), region = 64 }
  0x31   : > { %2789 = dma.done.wait (%p2685_p2), [#allocation3], 4096  }
  0x32   : > { %2791 = vsyncadd (%p2685_p2), [#allocation3], 4294963200 }
  0x33   : > { %2793 = dma.done.wait (%p2685_p2), [#allocation5], 1408  }
  0x34   : > { %2795 = vsyncadd (%p2685_p2), [#allocation5], 4294965888  ;;  %p420_p6 = scmp.lt.s32.totalorder %s2873_s18, 1  ;;  %vm438_vm0 = vcmask 130048   ;;  %v431_v2 = vld [vmem:[%s3372_s1] sm:$0xff]  ;;  %v2087_v5 = vld [vmem:[%s3373_s2 + $0x78] sm:$0xff] }
  0x35   : > { %2325 = vmatprep.mubr.msk.f32.mxu1 %vm438_vm0, %v431_v2  ;;  %v2086_v6 = vld [vmem:[%s3373_s2 + $0x70] sm:$0xff]  ;;  %2335 = vmatprep.subr.mxu0 %v2087_v5  ;;  %v2960_v7 = vld [vmem:[%s3372_s1 + $0x8] sm:$0xff]  ;;  %v2977_v10 = vld [vmem:[%s3372_s1 + $0x18] sm:$0xff]  ;;  %vm618_vm1 = vcmask 523264   ;;  %vm2806_vm2 = vmmov 0  }
  0x36   : > { %s3386_s18 = smov (!%p420_p6, %s2873_s18), 1  ;;  %2336 = vmatpush3.msra.mxu0 %v2087_v5  ;;  %v2965_v8 = vld [vmem:[%s3372_s1 + $0x10] sm:$0xff]  ;;  %v2085_v9 = vld [vmem:[%s3373_s2 + $0x68] sm:$0xff]  ;;  %v2084_v11 = vld [vmem:[%s3373_s2 + $0x60] sm:$0xff] }
  0x37   : > { %s2148_s19 = sshll.u32 %s3386_s18, 4  ;;  %2337 = vmatprep.subr.mxu0 %v2086_v6  ;;  %v2083_v12 = vld [vmem:[%s3373_s2 + $0x58] sm:$0xff]  ;;  %v2082_v13 = vld [vmem:[%s3373_s2 + $0x50] sm:$0xff]  ;;  %v2081_v14 = vld [vmem:[%s3373_s2 + $0x48] sm:$0xff]  ;;  %s2073_s28 = sshll.u32 %s3386_s18, 3 }
  0x38   : > { %s424_s24 = scalar_lea.vmem %s3371_s0, %s2148_s19  ;;  %2338 = vmatpush3.msra.mxu0 %v2086_v6  ;;  %v2080_v15 = vld [vmem:[%s3373_s2 + $0x40] sm:$0xff]  ;;  %v608_v16 = vld [vmem:[%s3373_s2 + $0x38] sm:$0xff]  ;;  %v607_v17 = vld [vmem:[%s3373_s2 + $0x30] sm:$0xff]  ;;  %s428_s12 = scalar_lea.vmem %s3382_s11, %s2073_s28 }
  0x39   : > { %v2941_v0 = vld [vmem:[%s424_s24 + $0x8] sm:$0xff]  ;;  %v2943_v1 = vld [vmem:[%s424_s24] sm:$0xff]  ;;  %2339 = vmatprep.subr.mxu0 %v2085_v9  ;;  %v604_v20 = vld [vmem:[%s3373_s2 + $0x18] sm:$0xff] }
  0x3a   : > { %v437_v3 = vmax.f32 %v2941_v0, 0.0  ;;  %v436_v4 = vmax.f32 %v2943_v1, 0.0  ;;  %2340 = vmatpush3.msra.mxu0 %v2085_v9  ;;  %v606_v18 = vld [vmem:[%s3373_s2 + $0x28] sm:$0xff]  ;;  %v605_v19 = vld [vmem:[%s3373_s2 + $0x20] sm:$0xff]  ;;  %v603_v21 = vld [vmem:[%s3373_s2 + $0x10] sm:$0xff] }
  0x3b   : > { %2341 = vmatprep.subr.mxu0 %v2084_v11  ;;  %v602_v22 = vld [vmem:[%s3373_s2 + $0x8] sm:$0xff]  ;;  %v601_v23 = vld [vmem:[%s3373_s2] sm:$0xff]  ;;  %v2099_v24 = vld [vmem:[%s3373_s2 + $0xb8] sm:$0xff] }
  0x3c   : > { %2321 = vmatprep.subr.mxu1 %v437_v3  ;;  %2342 = vmatpush3.msra.mxu0 %v2084_v11  ;;  %v2098_v27 = vld [vmem:[%s3373_s2 + $0xb0] sm:$0xff]  ;;  %v2097_v29 = vld [vmem:[%s3373_s2 + $0xa8] sm:$0xff]  ;;  %v2096_v31 = vld [vmem:[%s3373_s2 + $0xa0] sm:$0xff] }
  0x3d   : > { %2322 = vmatpush3.msra.mxu1 %v437_v3  ;;  %2351 = vmatprep.mubr.msk.f32.mxu0 %vm618_vm1, %v436_v4  ;;  %v2095_v32 = vld [vmem:[%s3373_s2 + $0x98] sm:$0xff]  ;;  %v2094_v33 = vld [vmem:[%s3373_s2 + $0x90] sm:$0xff]  ;;  %v2093_v34 = vld [vmem:[%s3373_s2 + $0x88] sm:$0xff] }
  0x3e   : > { %2323 = vmatprep.subr.mxu1 %v436_v4  ;;  %2343 = vmatprep.subr.mxu0 %v2083_v12  ;;  %v2092_v35 = vld [vmem:[%s3373_s2 + $0x80] sm:$0xff]  ;;  %v1049_v36 = vld [vmem:[%s3375_s4 + $0x78] sm:$0xff]  ;;  %v1048_v37 = vld [vmem:[%s3375_s4 + $0x70] sm:$0xff] }
  0x3f   : > { %2324 = vmatpush3.msra.mxu1 %v436_v4  ;;  %2344 = vmatpush3.msra.mxu0 %v2083_v12  ;;  %v1047_v38 = vld [vmem:[%s3375_s4 + $0x68] sm:$0xff]  ;;  %v1046_v39 = vld [vmem:[%s3375_s4 + $0x60] sm:$0xff]  ;;  %v1045_v40 = vld [vmem:[%s3375_s4 + $0x58] sm:$0xff] }
  0x40   : > { %2326 = vmatmul.mubr.msk.f32.vlgmr.msra.gmra.mxu1 %vm438_vm0, %v2960_v7  ;;  %2328 = vmatprep.subr.mxu1 %v437_v3  ;;  %v1044_v41 = vld [vmem:[%s3375_s4 + $0x50] sm:$0xff]  ;;  %v1043_v42 = vld [vmem:[%s3375_s4 + $0x48] sm:$0xff]  ;;  %v1042_v43 = vld [vmem:[%s3375_s4 + $0x40] sm:$0xff] }
  0x41   : > { %2329 = vmatpush3.msra.mxu1 %v437_v3  ;;  %2332 = vmatprep.mubr.msk.f32.mxu1 %vm438_vm0, %v2965_v8  ;;  %v1041_v44 = vld [vmem:[%s3375_s4 + $0x38] sm:$0xff]  ;;  %v1040_v45 = vld [vmem:[%s3375_s4 + $0x30] sm:$0xff]  ;;  %v1039_v46 = vld [vmem:[%s3375_s4 + $0x28] sm:$0xff] }
  0x42   : > { %2330 = vmatprep.subr.mxu1 %v436_v4  ;;  %2345 = vmatprep.subr.mxu0 %v2082_v13  ;;  %v1038_v47 = vld [vmem:[%s3375_s4 + $0x20] sm:$0xff]  ;;  %v1037_v48 = vld [vmem:[%s3375_s4 + $0x18] sm:$0xff]  ;;  %v1036_v49 = vld [vmem:[%s3375_s4 + $0x10] sm:$0xff] }
  0x43   : > { %2331 = vmatpush3.msra.mxu1 %v436_v4  ;;  %2346 = vmatpush3.msra.mxu0 %v2082_v13  ;;  %v2102_v56 = vld [vmem:[%s3374_s3] ss:$0 sm:$0xff]  ;;  %v2121_v4 = vld [vmem:[%s3375_s4 + $0xf0] sm:$0xff]  ;;  %v2120_v5 = vld [vmem:[%s3375_s4 + $0xe8] sm:$0xff] }
  0x44   : > { %2333 = vmatmul.mubr.msk.f32.vlgmr.msra.gmra.mxu1 %vm438_vm0, %v2977_v10  ;;  %2347 = vmatprep.subr.mxu0 %v2081_v14  ;;  %v2119_v6 = vld [vmem:[%s3375_s4 + $0xe0] sm:$0xff]  ;;  %v2116_v9 = vld [vmem:[%s3375_s4 + $0xc8] sm:$0xff]  ;;  %v2114_v11 = vld [vmem:[%s3375_s4 + $0xb8] sm:$0xff] }
  0x45   : > { %2396 = vmatprep.mubr.msk.f32.mxu1 %vm438_vm0, %v431_v2  ;;  %2348 = vmatpush3.msra.mxu0 %v2081_v14  ;;  %v2113_v12 = vld [vmem:[%s3375_s4 + $0xb0] sm:$0xff]  ;;  %v2112_v13 = vld [vmem:[%s3375_s4 + $0xa8] sm:$0xff]  ;;  %v2111_v14 = vld [vmem:[%s3375_s4 + $0xa0] sm:$0xff] }
  0x46   : > { %2349 = vmatprep.subr.mxu0 %v2080_v15 }
  0x47   : > { %2350 = vmatpush3.msra.mxu0 %v2080_v15  ;;  %v2110_v15 = vld [vmem:[%s3375_s4 + $0x98] sm:$0xff] }
  0x48   : > { %2352 = vmatmul.mubr.msk.f32.vlgmr.msra.gmra.mxu0 %vm618_vm1, %v437_v3  ;;  %2354 = vmatprep.subr.mxu0 %v608_v16  ;;  %v2122_v3 = vld [vmem:[%s3375_s4 + $0xf8] sm:$0xff] }
  0x49   : > { %2355 = vmatpush3.msra.mxu0 %v608_v16  ;;  %v2109_v16 = vld [vmem:[%s3375_s4 + $0x90] sm:$0xff] }
  0x4a   : > { %2356 = vmatprep.subr.mxu0 %v607_v17 }
  0x4b   : > { %2357 = vmatpush3.msra.mxu0 %v607_v17  ;;  %v2108_v17 = vld [vmem:[%s3375_s4 + $0x88] sm:$0xff] }
  0x4c   : > { %2358 = vmatprep.subr.mxu0 %v606_v18 }
  0x4d   : > { %2359 = vmatpush3.msra.mxu0 %v606_v18  ;;  %v2107_v18 = vld [vmem:[%s3375_s4 + $0x80] sm:$0xff] }
  0x4e   : > { %2360 = vmatprep.subr.mxu0 %v605_v19 }
  0x4f   : > { %2361 = vmatpush3.msra.mxu0 %v605_v19  ;;  %v2138_v19 = vld [vmem:[%s3375_s4 + $0x178] sm:$0xff] }
  0x50   : > { %2362 = vmatprep.subr.mxu0 %v604_v20 }
  0x51   : > { %2363 = vmatpush3.msra.mxu0 %v604_v20  ;;  %v2137_v20 = vld [vmem:[%s3375_s4 + $0x170] sm:$0xff] }
  0x52   : > { %2364 = vmatprep.subr.mxu0 %v603_v21 }
  0x53   : > { %2365 = vmatpush3.msra.mxu0 %v603_v21  ;;  %v2136_v21 = vld [vmem:[%s3375_s4 + $0x168] sm:$0xff] }
  0x54   : > { %2366 = vmatprep.subr.mxu0 %v602_v22 }
  0x55   : > { %2367 = vmatpush3.msra.mxu0 %v602_v22  ;;  %v2135_v22 = vld [vmem:[%s3375_s4 + $0x160] sm:$0xff] }
  0x56   : > { %2368 = vmatprep.subr.mxu0 %v601_v23 }
  0x57   : > { %2369 = vmatpush3.msra.mxu0 %v601_v23  ;;  %v2134_v23 = vld [vmem:[%s3375_s4 + $0x158] sm:$0xff] }
  0x58   : > { %2373 = vmatprep.subr.mxu0 %v2099_v24 }
 0x100   : > { %v2327_v25 = vpop.f32.mrf.mxu1 }
 0x102   : > { %v511_v26 = vpop.f32.mrf.mxu1 }
 0x103   : > { %2370 = vmatprep.mubr.msk.f32.mxu0 %vm618_vm1, %v511_v26  ;;  %v2131_v26 = vld [vmem:[%s3375_s4 + $0x140] sm:$0xff] }
 0x104   : > { %2371 = vmatmul.mubr.msk.f32.vlgmr.msra.gmra.mxu0 %vm618_vm1, %v2327_v25  ;;  %v2334_v28 = vpop.f32.mrf.mxu1  ;;  %v2132_v25 = vld [vmem:[%s3375_s4 + $0x148] sm:$0xff] }
 0x105   : > { %2374 = vmatpush3.msra.mxu0 %v2099_v24  ;;  %v2133_v24 = vld [vmem:[%s3375_s4 + $0x150] sm:$0xff] }
 0x106   : > { %2375 = vmatprep.subr.mxu0 %v2098_v27  ;;  %v592_v30 = vpop.f32.mrf.mxu1 }
 0x107   : > { %2376 = vmatpush3.msra.mxu0 %v2098_v27  ;;  %2389 = vmatprep.mubr.msk.f32.mxu0 %vm618_vm1, %v592_v30  ;;  %v2130_v27 = vld [vmem:[%s3375_s4 + $0x138] sm:$0xff]  ;;  %v2127_v30 = vld [vmem:[%s3375_s4 + $0x120] sm:$0xff] }
 0x108   : > { %2377 = vmatprep.subr.mxu0 %v2097_v29  ;;  %v2353_v50 = vpop.f32.mrf.mxu0 }
 0x109   : > { %2378 = vmatpush3.msra.mxu0 %v2097_v29  ;;  %v2128_v29 = vld [vmem:[%s3375_s4 + $0x128] sm:$0xff] }
 0x10a   : > { %2379 = vmatprep.subr.mxu0 %v2096_v31  ;;  %v691_v51 = vpop.f32.mrf.mxu0 }
 0x10b   : > { %2380 = vmatpush3.msra.mxu0 %v2096_v31  ;;  %v1035_v31 = vld [vmem:[%s3375_s4 + $0x8] sm:$0xff] }
 0x10c   : > { %2381 = vmatprep.subr.mxu0 %v2095_v32 }
 0x10d   : > { %2382 = vmatpush3.msra.mxu0 %v2095_v32  ;;  %v2126_v32 = vld [vmem:[%s3375_s4 + $0x118] sm:$0xff] }
 0x10e   : > { %2383 = vmatprep.subr.mxu0 %v2094_v33 }
 0x10f   : > { %2384 = vmatpush3.msra.mxu0 %v2094_v33  ;;  %v1034_v33 = vld [vmem:[%s3375_s4] sm:$0xff] }
 0x110   : > { %2385 = vmatprep.subr.mxu0 %v2093_v34 }
 0x111   : > { %2386 = vmatpush3.msra.mxu0 %v2093_v34  ;;  %v2125_v34 = vld [vmem:[%s3375_s4 + $0x110] sm:$0xff] }
 0x112   : > { %2387 = vmatprep.subr.mxu0 %v2092_v35 }
 0x113   : > { %2388 = vmatpush3.msra.mxu0 %v2092_v35  ;;  %v2124_v35 = vld [vmem:[%s3375_s4 + $0x108] sm:$0xff] }
 0x114   : > { %2390 = vmatmul.mubr.msk.f32.vlgmr.msra.gmra.mxu0 %vm618_vm1, %v2334_v28  ;;  %2441 = vmatprep.subr.mxu0 %v1049_v36  ;;  %v2129_v28 = vld [vmem:[%s3375_s4 + $0x130] sm:$0xff] }
 0x115   : > { %2442 = vmatpush3.msra.mxu0 %v1049_v36  ;;  %v2123_v36 = vld [vmem:[%s3375_s4 + $0x100] sm:$0xff] }
 0x116   : > { %2443 = vmatprep.subr.mxu0 %v1048_v37 }
 0x117   : > { %2444 = vmatpush3.msra.mxu0 %v1048_v37 }
 0x118   : > { %2445 = vmatprep.subr.mxu0 %v1047_v38 }
 0x119   : > { %2446 = vmatpush3.msra.mxu0 %v1047_v38 }
 0x11a   : > { %2447 = vmatprep.subr.mxu0 %v1046_v39 }
 0x11b   : > { %2448 = vmatpush3.msra.mxu0 %v1046_v39 }
 0x11c   : > { %2449 = vmatprep.subr.mxu0 %v1045_v40 }
 0x11d   : > { %2450 = vmatpush3.msra.mxu0 %v1045_v40 }
 0x11e   : > { %2451 = vmatprep.subr.mxu0 %v1044_v41 }
 0x11f   : > { %2452 = vmatpush3.msra.mxu0 %v1044_v41  ;;  %v2805_v41 = vmov 0.0  }
 0x120   : > { %2453 = vmatprep.subr.mxu0 %v1043_v42 }
 0x121   : > { %2454 = vmatpush3.msra.mxu0 %v1043_v42  ;;  %v1657_v42 = vld [vmem:[#allocation2 + $0xf8] sm:$0xff] }
 0x122   : > { %2455 = vmatprep.subr.mxu0 %v1042_v43 }
 0x123   : > { %2456 = vmatpush3.msra.mxu0 %v1042_v43  ;;  %v1656_v43 = vld [vmem:[#allocation2 + $0xf0] sm:$0xff] }
 0x124   : > { %2457 = vmatprep.subr.mxu0 %v1041_v44 }
 0x125   : > { %2458 = vmatpush3.msra.mxu0 %v1041_v44  ;;  %v1655_v44 = vld [vmem:[#allocation2 + $0xe8] sm:$0xff] }
 0x126   : > { %2459 = vmatprep.subr.mxu0 %v1040_v45 }
 0x127   : > { %2460 = vmatpush3.msra.mxu0 %v1040_v45  ;;  %v1654_v45 = vld [vmem:[#allocation2 + $0xe0] sm:$0xff] }
 0x128   : > { %2461 = vmatprep.subr.mxu0 %v1039_v46 }
 0x129   : > { %2462 = vmatpush3.msra.mxu0 %v1039_v46  ;;  %v1653_v46 = vld [vmem:[#allocation2 + $0xd8] sm:$0xff] }
 0x12a   : > { %2463 = vmatprep.subr.mxu0 %v1038_v47 }
 0x12b   : > { %2464 = vmatpush3.msra.mxu0 %v1038_v47  ;;  %v1652_v47 = vld [vmem:[#allocation2 + $0xd0] sm:$0xff] }
 0x12c   : > { %2465 = vmatprep.subr.mxu0 %v1037_v48 }
 0x12d   : > { %2466 = vmatpush3.msra.mxu0 %v1037_v48  ;;  %v1651_v48 = vld [vmem:[#allocation2 + $0xc8] sm:$0xff] }
 0x12e   : > { %2467 = vmatprep.subr.mxu0 %v1036_v49 }
 0x12f   : > { %2468 = vmatpush3.msra.mxu0 %v1036_v49  ;;  %v1650_v49 = vld [vmem:[#allocation2 + $0xc0] sm:$0xff] }
 0x130   : > { %2469 = vmatprep.subr.mxu0 %v1035_v31 }
 0x131   : > { %2470 = vmatpush3.msra.mxu0 %v1035_v31 }
 0x132   : > { %2471 = vmatprep.subr.mxu0 %v1034_v33 }
 0x133   : > { %2472 = vmatpush3.msra.mxu0 %v1034_v33 }
 0x134   : > { %2511 = vmatprep.subr.mxu0 %v2805_v41 }
 0x1c4   : > { %v2372_v52 = vpop.f32.mrf.mxu0 }
 0x1c5   : > { %v778_v54 = vadd.f32 %v2372_v52, %v2353_v50  ;;  %v1649_v50 = vld [vmem:[#allocation2 + $0xb8] sm:$0xff] }
 0x1c6   : > { %v772_v53 = vpop.f32.mrf.mxu0 }
 0x1c7   : > { %v773_v57 = vadd.f32 %v772_v53, %v691_v51  ;;  %v1648_v51 = vld [vmem:[#allocation2 + $0xb0] sm:$0xff] }
 0x1d4   : > { %v2391_v55 = vpop.f32.mrf.mxu0 }
 0x1d5   : > { %v872_v58 = vadd.f32 %v2391_v55, %v778_v54 }
 0x1d6   : > { %v862_v59 = vpop.f32.mrf.mxu0 }
 0x1d7   : > { %v881_v60 = vadd.f32 %v2102_v56, %v872_v58  ;;  %v871_v61 = vadd.f32 %v862_v59, %v773_v57  ;;  %v2139_v58 = vld [vmem:[%s3376_s5] ss:$0 sm:$0xff] }
 0x1d9   : > { %v3096_v62 = vmax.f32 %v881_v60, 0.0  ;;  %v880_v63 = vadd.f32 %v2102_v56, %v871_v61 }
 0x1db   : > { %v882_v2 = vmax.f32 %v880_v63, 0.0  ;;  %2392 = vmatprep.subr.mxu1 %v3096_v62 }
 0x1dc   : > { %2393 = vmatpush3.msra.mxu1 %v3096_v62 }
 0x1dd   : > { %2394 = vmatprep.subr.mxu1 %v882_v2 }
 0x1de   : > { %2395 = vmatpush3.msra.mxu1 %v882_v2 }
 0x1df   : > { %2397 = vmatmul.mubr.msk.f32.vlgmr.msra.gmra.mxu1 %vm438_vm0, %v2960_v7  ;;  %2399 = vmatprep.subr.mxu1 %v3096_v62  ;;  %v2118_v7 = vld [vmem:[%s3375_s4 + $0xd8] sm:$0xff] }
 0x1e0   : > { %2400 = vmatpush3.msra.mxu1 %v3096_v62  ;;  %2403 = vmatprep.mubr.msk.f32.mxu1 %vm438_vm0, %v2965_v8  ;;  %v2117_v8 = vld [vmem:[%s3375_s4 + $0xd0] sm:$0xff] }
 0x1e1   : > { %2401 = vmatprep.subr.mxu1 %v882_v2 }
 0x1e2   : > { %2402 = vmatpush3.msra.mxu1 %v882_v2 }
 0x1e3   : > { %2404 = vmatmul.mubr.msk.f32.vlgmr.msra.gmra.mxu1 %vm438_vm0, %v2977_v10  ;;  %2406 = vmatprep.subr.mxu1 %v2122_v3  ;;  %v2115_v10 = vld [vmem:[%s3375_s4 + $0xc0] sm:$0xff] }
 0x1e4   : > { %2407 = vmatpush3.msra.mxu1 %v2122_v3  ;;  %2438 = vmatprep.mubr.f32.mxu1 %v882_v2  ;;  %v1325_v3 = vld [vmem:[#allocation4] sm:$0xff] }
 0x1e5   : > { %2408 = vmatprep.subr.mxu1 %v2121_v4 }
 0x1e6   : > { %2409 = vmatpush3.msra.mxu1 %v2121_v4  ;;  %v3235_v4 = vld [vmem:[#allocation4 + $0x8] sm:$0xff] }
 0x1e7   : > { %2410 = vmatprep.subr.mxu1 %v2120_v5 }
 0x1e8   : > { %2411 = vmatpush3.msra.mxu1 %v2120_v5  ;;  %v1476_v5 = vld [vmem:[#allocation4 + $0x10] sm:$0xff] }
 0x1e9   : > { %2412 = vmatprep.subr.mxu1 %v2119_v6 }
 0x1ea   : > { %2413 = vmatpush3.msra.mxu1 %v2119_v6  ;;  %v1568_v6 = vld [vmem:[#allocation2 + $0x78] sm:$0xff] }
 0x1eb   : > { %2414 = vmatprep.subr.mxu1 %v2118_v7 }
 0x1ec   : > { %2415 = vmatpush3.msra.mxu1 %v2118_v7  ;;  %v1567_v7 = vld [vmem:[#allocation2 + $0x70] sm:$0xff] }
 0x1ed   : > { %2416 = vmatprep.subr.mxu1 %v2117_v8 }
 0x1ee   : > { %2417 = vmatpush3.msra.mxu1 %v2117_v8  ;;  %v1566_v8 = vld [vmem:[#allocation2 + $0x68] sm:$0xff] }
 0x1ef   : > { %2418 = vmatprep.subr.mxu1 %v2116_v9 }
 0x1f0   : > { %2419 = vmatpush3.msra.mxu1 %v2116_v9  ;;  %v1565_v9 = vld [vmem:[#allocation2 + $0x60] sm:$0xff] }
 0x1f1   : > { %2420 = vmatprep.subr.mxu1 %v2115_v10 }
 0x1f2   : > { %2421 = vmatpush3.msra.mxu1 %v2115_v10  ;;  %v1564_v10 = vld [vmem:[#allocation2 + $0x58] sm:$0xff] }
 0x1f3   : > { %2422 = vmatprep.subr.mxu1 %v2114_v11 }
 0x1f4   : > { %2423 = vmatpush3.msra.mxu1 %v2114_v11  ;;  %v1563_v11 = vld [vmem:[#allocation2 + $0x50] sm:$0xff] }
 0x1f5   : > { %2424 = vmatprep.subr.mxu1 %v2113_v12 }
 0x1f6   : > { %2425 = vmatpush3.msra.mxu1 %v2113_v12  ;;  %v1562_v12 = vld [vmem:[#allocation2 + $0x48] sm:$0xff] }
 0x1f7   : > { %2426 = vmatprep.subr.mxu1 %v2112_v13 }
 0x1f8   : > { %2427 = vmatpush3.msra.mxu1 %v2112_v13  ;;  %v1561_v13 = vld [vmem:[#allocation2 + $0x40] sm:$0xff] }
 0x1f9   : > { %2428 = vmatprep.subr.mxu1 %v2111_v14 }
 0x1fa   : > { %2429 = vmatpush3.msra.mxu1 %v2111_v14  ;;  %v1560_v14 = vld [vmem:[#allocation2 + $0x38] sm:$0xff] }
 0x1fb   : > { %2430 = vmatprep.subr.mxu1 %v2110_v15 }
 0x1fc   : > { %2431 = vmatpush3.msra.mxu1 %v2110_v15  ;;  %v1559_v15 = vld [vmem:[#allocation2 + $0x30] sm:$0xff] }
 0x1fd   : > { %2432 = vmatprep.subr.mxu1 %v2109_v16 }
 0x1fe   : > { %2433 = vmatpush3.msra.mxu1 %v2109_v16  ;;  %v1558_v16 = vld [vmem:[#allocation2 + $0x28] sm:$0xff] }
 0x1ff   : > { %2434 = vmatprep.subr.mxu1 %v2108_v17 }
 0x200   : > { %2435 = vmatpush3.msra.mxu1 %v2108_v17  ;;  %v1647_v17 = vld [vmem:[#allocation2 + $0xa8] sm:$0xff] }
 0x201   : > { %2436 = vmatprep.subr.mxu1 %v2107_v18 }
 0x202   : > { %2437 = vmatpush3.msra.mxu1 %v2107_v18  ;;  %v1557_v18 = vld [vmem:[#allocation2 + $0x20] sm:$0xff] }
 0x203   : > { %2439 = vmatmul.mubr.f32.vlgmr.msra.gmra.mxu1 %v3096_v62  ;;  %2476 = vmatprep.subr.mxu1 %v2138_v19 }
 0x204   : > { %2477 = vmatpush3.msra.mxu1 %v2138_v19  ;;  %v1646_v19 = vld [vmem:[#allocation2 + $0xa0] sm:$0xff] }
 0x205   : > { %2478 = vmatprep.subr.mxu1 %v2137_v20 }
 0x206   : > { %2479 = vmatpush3.msra.mxu1 %v2137_v20  ;;  %v1556_v20 = vld [vmem:[#allocation2 + $0x18] sm:$0xff] }
 0x207   : > { %2480 = vmatprep.subr.mxu1 %v2136_v21 }
 0x208   : > { %2481 = vmatpush3.msra.mxu1 %v2136_v21  ;;  %v1645_v21 = vld [vmem:[#allocation2 + $0x98] sm:$0xff] }
 0x209   : > { %2482 = vmatprep.subr.mxu1 %v2135_v22 }
 0x20a   : > { %2483 = vmatpush3.msra.mxu1 %v2135_v22  ;;  %v1555_v22 = vld [vmem:[#allocation2 + $0x10] sm:$0xff] }
 0x20b   : > { %2484 = vmatprep.subr.mxu1 %v2134_v23 }
 0x20c   : > { %2485 = vmatpush3.msra.mxu1 %v2134_v23  ;;  %v1644_v23 = vld [vmem:[#allocation2 + $0x90] sm:$0xff] }
 0x20d   : > { %2486 = vmatprep.subr.mxu1 %v2133_v24 }
 0x20e   : > { %2487 = vmatpush3.msra.mxu1 %v2133_v24  ;;  %v1554_v24 = vld [vmem:[#allocation2 + $0x8] sm:$0xff] }
 0x20f   : > { %2488 = vmatprep.subr.mxu1 %v2132_v25 }
 0x210   : > { %2489 = vmatpush3.msra.mxu1 %v2132_v25  ;;  %v1643_v25 = vld [vmem:[#allocation2 + $0x88] sm:$0xff] }
 0x211   : > { %2490 = vmatprep.subr.mxu1 %v2131_v26 }
 0x212   : > { %2491 = vmatpush3.msra.mxu1 %v2131_v26  ;;  %v1553_v26 = vld [vmem:[#allocation2] sm:$0xff] }
 0x213   : > { %2492 = vmatprep.subr.mxu1 %v2130_v27 }
 0x214   : > { %2493 = vmatpush3.msra.mxu1 %v2130_v27  ;;  %v1642_v27 = vld [vmem:[#allocation2 + $0x80] sm:$0xff] }
 0x215   : > { %2494 = vmatprep.subr.mxu1 %v2129_v28 }
 0x216   : > { %2495 = vmatpush3.msra.mxu1 %v2129_v28  ;;  %v1320_v28 = vlaneseq }
 0x217   : > { %2496 = vmatprep.subr.mxu1 %v2128_v29 }
 0x218   : > { %2497 = vmatpush3.msra.mxu1 %v2128_v29  ;;  %v1321_v29 = vshrl.u32 %v1320_v28, 7 }
 0x219   : > { %2498 = vmatprep.subr.mxu1 %v2127_v30 }
 0x21a   : > { %2499 = vmatpush3.msra.mxu1 %v2127_v30  ;;  %vm1324_vm3 = vcmp.ge.s32.totalorder %v1321_v29, 1 }
 0x21b   : > { %2500 = vmatprep.subr.mxu1 %v2126_v32 }
 0x21c   : > { %2501 = vmatpush3.msra.mxu1 %v2126_v32 }
 0x21d   : > { %2502 = vmatprep.subr.mxu1 %v2125_v34 }
 0x21e   : > { %2503 = vmatpush3.msra.mxu1 %v2125_v34 }
 0x21f   : > { %2504 = vmatprep.subr.mxu1 %v2124_v35 }
 0x220   : > { %2505 = vmatpush3.msra.mxu1 %v2124_v35 }
 0x221   : > { %2506 = vmatprep.subr.mxu1 %v2123_v36 }
 0x222   : > { %2507 = vmatpush3.msra.mxu1 %v2123_v36 }
 0x223   : > { %2567 = vmatprep.subr.mxu1 %v2805_v41 }
 0x29f   : > { %v2398_v37 = vpop.f32.mrf.mxu1 }
 0x2a1   : > { %v950_v38 = vpop.f32.mrf.mxu1 }
 0x2a2   : > { %2473 = vmatprep.mubr.f32.mxu0 %v950_v38 }
 0x2a3   : > { %v2405_v39 = vpop.f32.mrf.mxu1  ;;  %2474 = vmatmul.mubr.f32.vlgmr.msra.gmra.mxu0 %v2398_v37 }
 0x2a4   : > { %2515 = vmatprep.mubr.msk.f32.mxu0 %vm2806_vm2, %v2805_v41 }
 0x2a5   : > { %v1025_v40 = vpop.f32.mrf.mxu1 }
 0x2a6   : > { %2508 = vmatprep.mubr.f32.mxu1 %v1025_v40  ;;  %v1745_v40 = vld [vmem:[%s3379_s8 + $0x70] sm:$0xff] }
 0x2a7   : > { %2509 = vmatmul.mubr.f32.vlgmr.msra.gmra.mxu1 %v2405_v39  ;;  %v1746_v39 = vld [vmem:[%s3379_s8 + $0x78] sm:$0xff] }
 0x2a8   : > { %2599 = vmatprep.mubr.msk.f32.mxu1 %vm2806_vm2, %v2805_v41  ;;  %2568 = vmatpush3.msra.mxu1 %v1657_v42  ;;  %v1744_v42 = vld [vmem:[%s3379_s8 + $0x68] sm:$0xff] }
 0x2a9   : > { %2569 = vmatprep.subr.mxu1 %v2805_v41 }
 0x2aa   : > { %2570 = vmatpush3.msra.mxu1 %v1656_v43  ;;  %v1824_v43 = vld [vmem:[#allocation6 + $0x38] sm:$0xff] }
 0x2ab   : > { %2571 = vmatprep.subr.mxu1 %v2805_v41 }
 0x2ac   : > { %2572 = vmatpush3.msra.mxu1 %v1655_v44  ;;  %v1742_v44 = vld [vmem:[%s3379_s8 + $0x58] sm:$0xff] }
 0x2ad   : > { %2573 = vmatprep.subr.mxu1 %v2805_v41 }
 0x2ae   : > { %2574 = vmatpush3.msra.mxu1 %v1654_v45  ;;  %v1822_v45 = vld [vmem:[#allocation6 + $0x28] sm:$0xff] }
 0x2af   : > { %2575 = vmatprep.subr.mxu1 %v2805_v41 }
 0x2b0   : > { %2576 = vmatpush3.msra.mxu1 %v1653_v46  ;;  %v1741_v46 = vld [vmem:[%s3379_s8 + $0x50] sm:$0xff] }
 0x2b1   : > { %2577 = vmatprep.subr.mxu1 %v2805_v41 }
 0x2b2   : > { %2578 = vmatpush3.msra.mxu1 %v1652_v47  ;;  %v1821_v47 = vld [vmem:[#allocation6 + $0x20] sm:$0xff] }
 0x2b3   : > { %2579 = vmatprep.subr.mxu1 %v2805_v41 }
 0x2b4   : > { %2580 = vmatpush3.msra.mxu1 %v1651_v48  ;;  %v1740_v48 = vld [vmem:[%s3379_s8 + $0x48] sm:$0xff] }
 0x2b5   : > { %2581 = vmatprep.subr.mxu1 %v2805_v41 }
 0x2b6   : > { %2582 = vmatpush3.msra.mxu1 %v1650_v49  ;;  %v1820_v49 = vld [vmem:[#allocation6 + $0x18] sm:$0xff] }
 0x2b7   : > { %2583 = vmatprep.subr.mxu1 %v2805_v41 }
 0x2b8   : > { %2584 = vmatpush3.msra.mxu1 %v1649_v50  ;;  %v1739_v50 = vld [vmem:[%s3379_s8 + $0x40] sm:$0xff] }
 0x2b9   : > { %2585 = vmatprep.subr.mxu1 %v2805_v41 }
 0x2ba   : > { %2586 = vmatpush3.msra.mxu1 %v1648_v51  ;;  %v1738_v51 = vld [vmem:[%s3379_s8 + $0x38] sm:$0xff] }
 0x2bb   : > { %2587 = vmatprep.subr.mxu1 %v2805_v41 }
 0x2bc   : > { %2588 = vmatpush3.msra.mxu1 %v1647_v17 }
 0x2bd   : > { %2589 = vmatprep.subr.mxu1 %v2805_v41 }
 0x2be   : > { %2590 = vmatpush3.msra.mxu1 %v1646_v19 }
 0x2bf   : > { %2591 = vmatprep.subr.mxu1 %v2805_v41 }
 0x2c0   : > { %2592 = vmatpush3.msra.mxu1 %v1645_v21 }
 0x2c1   : > { %2593 = vmatprep.subr.mxu1 %v2805_v41 }
 0x2c2   : > { %2594 = vmatpush3.msra.mxu1 %v1644_v23 }
 0x2c3   : > { %v2440_v52 = vpop.f32.mrf.mxu1  ;;  %2595 = vmatprep.subr.mxu1 %v2805_v41 }
 0x2c4   : > { %2596 = vmatpush3.msra.mxu1 %v1643_v25 }
 0x2c5   : > { %v1133_v54 = vpop.f32.mrf.mxu1  ;;  %2597 = vmatprep.subr.mxu1 %v2805_v41 }
 0x2c6   : > { %2598 = vmatpush3.msra.mxu1 %v1642_v27 }
 0x2c7   : > { %2628 = vmatprep.subr.mxu1 %v2805_v41 }
 0x363   : > { %v2475_v53 = vpop.f32.mrf.mxu0 }
 0x364   : > { %v1214_v56 = vadd.f32 %v2475_v53, %v2440_v52  ;;  %v1737_v52 = vld [vmem:[%s3379_s8 + $0x30] sm:$0xff]  ;;  %v1736_v53 = vld [vmem:[%s3379_s8 + $0x28] sm:$0xff] }
 0x365   : > { %v1208_v55 = vpop.f32.mrf.mxu0 }
 0x366   : > { %v1209_v59 = vadd.f32 %v1208_v55, %v1133_v54  ;;  %v1735_v54 = vld [vmem:[%s3379_s8 + $0x20] sm:$0xff]  ;;  %v1734_v55 = vld [vmem:[%s3379_s8 + $0x18] sm:$0xff] }
 0x367   : > { %v2510_v57 = vpop.f32.mrf.mxu1 }
 0x368   : > { %v1310_v60 = vadd.f32 %v2510_v57, %v1214_v56  ;;  %v1819_v56 = vld [vmem:[#allocation6 + $0x10] sm:$0xff]  ;;  %v1733_v57 = vld [vmem:[%s3379_s8 + $0x10] sm:$0xff] }
 0x369   : > { %v1300_v61 = vpop.f32.mrf.mxu1 }
 0x36a   : > { %v1319_v62 = vadd.f32 %v2139_v58, %v1310_v60  ;;  %v1309_v63 = vadd.f32 %v1300_v61, %v1209_v59  ;;  %v1732_v59 = vld [vmem:[%s3379_s8 + $0x8] sm:$0xff]  ;;  %v1817_v60 = vld [vmem:[#allocation6] sm:$0xff]  ;;  %v1731_v61 = vld [vmem:[%s3379_s8] sm:$0xff] }
 0x36c   : > { %v1318_v2 = vadd.f32 %v2139_v58, %v1309_v63  ;;  %2512 = vmatpush3.msra.mxu0 %v1319_v62  ;;  %v1818_v58 = vld [vmem:[#allocation6 + $0x8] sm:$0xff] }
 0x36d   : > { %2513 = vmatprep.subr.mxu0 %v2805_v41 }
 0x36e   : > { %2514 = vmatpush3.msra.mxu0 %v1318_v2 }
 0x36f   : > { %2516 = vmatmul.mubr.msk.f32.vlgmr.msra.gmra.mxu0 %vm438_vm0, %v1325_v3  ;;  %2518 = vmatprep.subr.mxu0 %v2805_v41 }
 0x370   : > { %2519 = vmatpush3.msra.mxu0 %v1319_v62  ;;  %2522 = vmatprep.mubr.msk.f32.mxu0 %vm2806_vm2, %v2805_v41 }
 0x371   : > { %2520 = vmatprep.subr.mxu0 %v2805_v41 }
 0x372   : > { %2521 = vmatpush3.msra.mxu0 %v1318_v2 }
 0x373   : > { %2523 = vmatmul.mubr.msk.f32.vlgmr.msra.gmra.mxu0 %vm438_vm0, %v3235_v4  ;;  %2525 = vmatprep.subr.mxu0 %v2805_v41 }
 0x374   : > { %2526 = vmatpush3.msra.mxu0 %v1319_v62  ;;  %2529 = vmatprep.mubr.msk.f32.mxu0 %vm2806_vm2, %v2805_v41  ;;  %v1323_v62 = vand.u32 127, %v1320_v28 }
 0x375   : > { %2527 = vmatprep.subr.mxu0 %v2805_v41 }
 0x376   : > { %2528 = vmatpush3.msra.mxu0 %v1318_v2  ;;  %vm1552_vm4 = vcmp.ge.s32.totalorder %v1323_v62, 8  ;;  %vm1640_vm5 = vcmp.lt.s32.totalorder %v1323_v62, 120 }
 0x377   : > { %2530 = vmatmul.mubr.msk.f32.vlgmr.msra.gmra.mxu0 %vm438_vm0, %v1476_v5  ;;  %2532 = vmatprep.subr.mxu0 %v2805_v41 }
 0x378   : > { %2533 = vmatpush3.msra.mxu0 %v1568_v6  ;;  %2564 = vmatprep.mubr.msk.f32.mxu0 %vm2806_vm2, %v2805_v41 }
 0x379   : > { %2534 = vmatprep.subr.mxu0 %v2805_v41 }
 0x37a   : > { %2535 = vmatpush3.msra.mxu0 %v1567_v7 }
 0x37b   : > { %2536 = vmatprep.subr.mxu0 %v2805_v41 }
 0x37c   : > { %2537 = vmatpush3.msra.mxu0 %v1566_v8 }
 0x37d   : > { %2538 = vmatprep.subr.mxu0 %v2805_v41 }
 0x37e   : > { %2539 = vmatpush3.msra.mxu0 %v1565_v9 }
 0x37f   : > { %2540 = vmatprep.subr.mxu0 %v2805_v41 }
 0x380   : > { %2541 = vmatpush3.msra.mxu0 %v1564_v10  ;;  %v2144_v10 = vld [vmem:[%s3381_s10] ss:$0 sm:$0xff] }
 0x381   : > { %2542 = vmatprep.subr.mxu0 %v2805_v41 }
 0x382   : > { %2543 = vmatpush3.msra.mxu0 %v1563_v11 }
 0x383   : > { %2544 = vmatprep.subr.mxu0 %v2805_v41 }
 0x384   : > { %2545 = vmatpush3.msra.mxu0 %v1562_v12 }
 0x385   : > { %2546 = vmatprep.subr.mxu0 %v2805_v41 }
 0x386   : > { %2547 = vmatpush3.msra.mxu0 %v1561_v13 }
 0x387   : > { %2548 = vmatprep.subr.mxu0 %v2805_v41 }
 0x388   : > { %2549 = vmatpush3.msra.mxu0 %v1560_v14 }
 0x389   : > { %2550 = vmatprep.subr.mxu0 %v2805_v41 }
 0x38a   : > { %2551 = vmatpush3.msra.mxu0 %v1559_v15 }
 0x38b   : > { %2552 = vmatprep.subr.mxu0 %v2805_v41 }
 0x38c   : > { %2553 = vmatpush3.msra.mxu0 %v1558_v16 }
 0x38d   : > { %2554 = vmatprep.subr.mxu0 %v2805_v41 }
 0x38e   : > { %2555 = vmatpush3.msra.mxu0 %v1557_v18 }
 0x38f   : > { %2556 = vmatprep.subr.mxu0 %v2805_v41 }
 0x390   : > { %2557 = vmatpush3.msra.mxu0 %v1556_v20 }
 0x391   : > { %2558 = vmatprep.subr.mxu0 %v2805_v41 }
 0x392   : > { %2559 = vmatpush3.msra.mxu0 %v1555_v22 }
 0x393   : > { %2560 = vmatprep.subr.mxu0 %v2805_v41 }
 0x394   : > { %2561 = vmatpush3.msra.mxu0 %v1554_v24 }
 0x395   : > { %2562 = vmatprep.subr.mxu0 %v2805_v41 }
 0x396   : > { %2563 = vmatpush3.msra.mxu0 %v1553_v26 }
 0x397   : > { %2602 = vmatprep.subr.mxu0 %v2805_v41 }
 0x42f   : > { %v1395_v30 = vpop.f32.mrf.mxu0 }
 0x430   : > { %v1399_v33 = vsel %vm1324_vm3, %v1395_v30, -3e+38 }
 0x431   : > { %v2517_v31 = vpop.f32.mrf.mxu0 }
 0x433   : > { %v1471_v32 = vpop.f32.mrf.mxu0 }
 0x434   : > { %v1550_v35 = vmax.f32 %v1399_v33, %v1471_v32 }
 0x435   : > { %v2524_v34 = vpop.f32.mrf.mxu0 }
 0x437   : > { %v1546_v36 = vpop.f32.mrf.mxu0 }
 0x438   : > { %v3271_v37 = vmax.f32 %v1550_v35, %v1546_v36 }
 0x439   : > { %v2531_v38 = vpop.f32.mrf.mxu0 }
 0x43a   : > { %2565 = vmatmul.mubr.f32.vlgmr.msra.gmra.mxu0 %v3271_v37  ;;  %2600 = vmatmul.mubr.f32.vlgmr.msra.gmra.mxu1 %v3271_v37 }
 0x43b   : > { %2603 = vmatpush3.msra.mxu0 %v2941_v0  ;;  %2606 = vmatprep.mubr.msk.f32.mxu0 %vm2806_vm2, %v2805_v41  ;;  %v1743_v0 = vld [vmem:[%s3379_s8 + $0x60] sm:$0xff] }
 0x43c   : > { %2604 = vmatprep.subr.mxu0 %v2805_v41  ;;  %2629 = vmatpush3.msra.mxu1 %v1746_v39 }
 0x43d   : > { %2605 = vmatpush3.msra.mxu0 %v2943_v1  ;;  %2630 = vmatprep.subr.mxu1 %v2805_v41  ;;  %v1823_v1 = vld [vmem:[#allocation6 + $0x30] sm:$0xff] }
 0x43e   : > { %2607 = vmatmul.mubr.msk.f32.vlgmr.msra.gmra.mxu0 %vm438_vm0, %v3235_v4  ;;  %2631 = vmatpush3.msra.mxu1 %v1745_v40 }
 0x43f   : > { %2632 = vmatprep.subr.mxu1 %v2805_v41  ;;  %2609 = vmatprep.subr.mxu0 %v2805_v41 }
 0x440   : > { %2633 = vmatpush3.msra.mxu1 %v1744_v42  ;;  %2610 = vmatpush3.msra.mxu0 %v1824_v43 }
 0x441   : > { %2634 = vmatprep.subr.mxu1 %v2805_v41  ;;  %2611 = vmatprep.subr.mxu0 %v2805_v41 }
 0x442   : > { %2635 = vmatpush3.msra.mxu1 %v1743_v0  ;;  %2612 = vmatpush3.msra.mxu0 %v1823_v1 }
 0x443   : > { %2636 = vmatprep.subr.mxu1 %v2805_v41  ;;  %2613 = vmatprep.subr.mxu0 %v2805_v41 }
 0x444   : > { %2637 = vmatpush3.msra.mxu1 %v1742_v44  ;;  %2614 = vmatpush3.msra.mxu0 %v1822_v45 }
 0x445   : > { %2638 = vmatprep.subr.mxu1 %v2805_v41  ;;  %2615 = vmatprep.subr.mxu0 %v2805_v41 }
 0x446   : > { %2639 = vmatpush3.msra.mxu1 %v1741_v46  ;;  %2616 = vmatpush3.msra.mxu0 %v1821_v47 }
 0x447   : > { %2640 = vmatprep.subr.mxu1 %v2805_v41  ;;  %2617 = vmatprep.subr.mxu0 %v2805_v41 }
 0x448   : > { %2641 = vmatpush3.msra.mxu1 %v1740_v48  ;;  %2618 = vmatpush3.msra.mxu0 %v1820_v49 }
 0x449   : > { %2642 = vmatprep.subr.mxu1 %v2805_v41  ;;  %2619 = vmatprep.subr.mxu0 %v2805_v41 }
 0x44a   : > { %2643 = vmatpush3.msra.mxu1 %v1739_v50  ;;  %2625 = vmatprep.mubr.msk.f32.mxu0 %vm2806_vm2, %v2805_v41 }
 0x44b   : > { %2644 = vmatprep.subr.mxu1 %v2805_v41  ;;  %2660 = vmatprep.mubr.msk.f32.mxu1 %vm2806_vm2, %v2805_v41 }
 0x44c   : > { %2645 = vmatpush3.msra.mxu1 %v1738_v51  ;;  %2620 = vmatpush3.msra.mxu0 %v1819_v56 }
 0x44d   : > { %2646 = vmatprep.subr.mxu1 %v2805_v41  ;;  %2621 = vmatprep.subr.mxu0 %v2805_v41 }
 0x44e   : > { %2647 = vmatpush3.msra.mxu1 %v1737_v52  ;;  %2622 = vmatpush3.msra.mxu0 %v1818_v58 }
 0x44f   : > { %2648 = vmatprep.subr.mxu1 %v2805_v41  ;;  %2623 = vmatprep.subr.mxu0 %v2805_v41 }
 0x450   : > { %2649 = vmatpush3.msra.mxu1 %v1736_v53  ;;  %2624 = vmatpush3.msra.mxu0 %v1817_v60 }
 0x451   : > { %2650 = vmatprep.subr.mxu1 %v2805_v41 }
 0x452   : > { %2651 = vmatpush3.msra.mxu1 %v1735_v54 }
 0x453   : > { %2652 = vmatprep.subr.mxu1 %v2805_v41 }
 0x454   : > { %2653 = vmatpush3.msra.mxu1 %v1734_v55 }
 0x455   : > { %2654 = vmatprep.subr.mxu1 %v2805_v41 }
 0x456   : > { %2655 = vmatpush3.msra.mxu1 %v1733_v57 }
 0x457   : > { %2656 = vmatprep.subr.mxu1 %v2805_v41 }
 0x458   : > { %2657 = vmatpush3.msra.mxu1 %v1732_v59 }
 0x459   : > { %2658 = vmatprep.subr.mxu1 %v2805_v41 }
 0x45a   : > { %2659 = vmatpush3.msra.mxu1 %v1731_v61 }
 0x4fa   : > { %v1635_v63 = vpop.f32.mrf.mxu0  ;;  %v1724_v2 = vpop.f32.mrf.mxu1 }
 0x4fb   : > { %v1639_v3 = vsel %vm1552_vm4, %v1635_v63, -3e+38  ;;  %v1728_v7 = vsel %vm1640_vm5, %v1724_v2, -3e+38 }
 0x4fc   : > { %v1729_v4 = vmax.f32 %v1639_v3, %v3271_v37  ;;  %v2566_v5 = vpop.f32.mrf.mxu0  ;;  %v2601_v6 = vpop.f32.mrf.mxu1 }
 0x4fe   : > { %v1730_v8 = vmax.f32 %v1729_v4, %v1728_v7  ;;  %v1813_v41 = vpop.f32.mrf.mxu0 }
 0x4ff   : > { %2626 = vmatmul.mubr.msk.f32.vlgmr.msra.gmra.mxu0 %vm618_vm1, %v1813_v41 }
 0x500   : > { %v2608_v9 = vpop.f32.mrf.mxu0  ;;  %2661 = vmatmul.mubr.f32.vlgmr.msra.gmra.mxu1 %v1730_v8 }
 0x5bf   : > { %v1901_v11 = vpop.f32.mrf.mxu0 }
 0x5c0   : > { %v1902_v12 = vadd.f32 %v2144_v10, %v1901_v11  ;;  %v1971_v13 = vpop.f32.mrf.mxu1 }
 0x5c1   : > { %v2627_v14 = vpop.f32.mrf.mxu0 }
 0x5c2   : > { %v1972_v15 = vadd.f32 %v1971_v13, %v1902_v12  ;;  %v2662_v16 = vpop.f32.mrf.mxu1 }
 0x5c4   : > { %1975 = vst.msk [vmem:[%s428_s12] sm:$0xff] %vm618_vm1, %v1972_v15 }
 0x5c5 PF: > { %s23_s17 = sadd.s32 1, %s2798_s17  }
 0x5c6   : > { %p20_p2 = scmp.ge.s32.totalorder %s23_s17, 4  }
 0x5c8   :  { %22 = sbr.rel (!%p20_p2) target bundleno = 2 (0x2), region = 115 }
 0x5cd   :  { %1995 = vsyncpa [#allocation3], 1 }
 0x5ce   :  { %1997 = vsyncpa [#allocation3 + $0x1], 1 }
 0x5cf   :  { %1998 = vsyncpa [#allocation5], 1 }

</bundles_post_ra>
